<compile_context>
chip_gen: v5e
topology: v5e:2x2
jax: 0.10.0
libtpu: 0.0.40
codegen_flags: <defaults>
</compile_context>

<pallas_src>
import jax
import jax.numpy as jnp
from jax import lax
from jax.experimental import pallas as pl
from jax.experimental.pallas import tpu as pltpu

FEATURE_DIM = 2048   # matches nn.Linear(2048, num_class)
LANE = 128
SUBLANE = 8


def _round_up(x, m):
    return (x + m - 1) // m * m


def net_kernel(x_ref, w_enc_ref, w_fc_ref, b_fc_ref, out_ref):
    """Fused forward: global-avg-pool -> encoder projection -> ReLU -> fc + bias.

    x_ref:     (bm, C, HW)     f32   batch tile of images (source dtype; no wrapper cast)
    w_enc_ref: (C, 2048)       f32   encoder stand-in projection weight
    w_fc_ref:  (2048, NC_pad)  bf16  fc.weight pre-transposed to MXU-native (K, N)
    b_fc_ref:  (1, NC_pad)     f32   fc.bias, class dim zero-padded to 128
    out_ref:   (bm, NC_pad)    f32
    """
    hw = x_ref.shape[-1]
    # Global average pool over H*W: lane-axis reduction (XLU), f32.
    pooled = jnp.sum(x_ref[...], axis=-1) * (1.0 / hw)            # (bm, C)
    # Encoder stand-in projection: tiny-K (K = C) contraction, f32 accumulate.
    feat = jnp.dot(pooled, w_enc_ref[...],
                   preferred_element_type=jnp.float32)            # (bm, 2048)
    # ReLU epilogue in f32 (v5e-safe; bf16 VALU not assumed), then bf16 for the MXU.
    feat = jnp.maximum(feat, 0.0).astype(jnp.bfloat16)
    # fc: MXU-native (M, K) @ (K, N) bf16 matmul, f32 accumulation.
    out = jnp.dot(feat, w_fc_ref[...], preferred_element_type=jnp.float32)
    out_ref[...] = out + b_fc_ref[...]


def prepare_params(w_enc, w_fc, b_fc):
    """One-time parameter layout/dtype prep. Call ONCE and cache the result —
    do not rebuild per forward (avoids a per-call XLA pad/cast/transpose pass)."""
    num_class, _ = w_fc.shape
    nc_pad = _round_up(num_class, LANE)
    w_enc_p = jnp.asarray(w_enc, dtype=jnp.float32)                          # (C, 2048)
    # fc weight pre-transposed to (K=2048, N=nc_pad), padded class columns are zero.
    w_fcT = jnp.pad(w_fc, ((0, nc_pad - num_class), (0, 0))).T.astype(jnp.bfloat16)
    b_fc_p = jnp.pad(b_fc, (0, nc_pad - num_class)).reshape(1, nc_pad).astype(jnp.float32)
    return w_enc_p, w_fcT, b_fc_p, num_class


def _pick_bm(B, x_row_bytes):
    """Batch-tile rows: >= 2 grid steps once B >= 32 (v7x 2nd TC + DMA/compute
    overlap), capped at 256 rows (v6e/v7x MXU fill; v5e just takes two passes)
    and by a ~12 MiB-per-buffer VMEM budget on the f32 x tile."""
    vmem_rows = max(SUBLANE, ((12 << 20) // max(x_row_bytes, 1)) // SUBLANE * SUBLANE)
    if B < 32:
        bm = _round_up(max(B, 1), SUBLANE)
    else:
        bm = min(256, _round_up((B + 1) // 2, 16))
    return int(max(SUBLANE, min(bm, vmem_rows)))


def net_forward(x_nchw, params):
    """Forward pass. `params` must come from prepare_params (cached across calls).
    The wrapper does only free layout plumbing: a contiguous reshape of x and an
    optional zero pad of the ragged last batch tile. x stays in its source dtype
    (f32); the kernel reads it once from HBM (~4 B/elem) and pools on-chip."""
    w_enc, w_fcT, b_fc_p, num_class = params
    B, C, H, W = x_nchw.shape
    HW = H * W
    feat_dim = w_enc.shape[1]
    nc_pad = w_fcT.shape[1]

    bm = _pick_bm(B, C * HW * 4)
    b_pad = _round_up(B, bm)

    x3d = x_nchw.reshape(B, C, HW)                    # contiguous view, no data pass
    if b_pad != B:                                    # pad only the ragged last tile
        x3d = jnp.pad(x3d, ((0, b_pad - B), (0, 0), (0, 0)))

    grid = (b_pad // bm,)

    # VMEM: double-buffered x/out tiles + (default double-buffered, tiny) weights.
    vmem_bytes = (2 * bm * C * HW * 4                 # x tile, f32, double-buffered
                  + 2 * bm * nc_pad * 4               # out tile, f32, double-buffered
                  + 2 * (C * feat_dim * 4             # encoder weight, f32
                         + feat_dim * nc_pad * 2      # fc weight, bf16
                         + nc_pad * 4)                # bias
                  + bm * feat_dim * 4)                # feat intermediate headroom
    vmem_limit = int(min(max(2 * vmem_bytes, 8 << 20), 48 << 20))

    out = pl.pallas_call(
        net_kernel,
        out_shape=jax.ShapeDtypeStruct((b_pad, nc_pad), jnp.float32),
        grid_spec=pltpu.PrefetchScalarGridSpec(
            num_scalar_prefetch=0,
            grid=grid,
            in_specs=[
                pl.BlockSpec((bm, C, HW), lambda i: (i, 0, 0)),
                pl.BlockSpec((C, feat_dim), lambda i: (0, 0)),
                pl.BlockSpec((feat_dim, nc_pad), lambda i: (0, 0)),
                pl.BlockSpec((1, nc_pad), lambda i: (0, 0)),
            ],
            out_specs=pl.BlockSpec((bm, nc_pad), lambda i: (i, 0)),
        ),
        compiler_params=pltpu.CompilerParams(
            dimension_semantics=("parallel",),        # batch axis -> 2nd TC on v7x
            vmem_limit_bytes=vmem_limit,
        ),
    )(x3d, w_enc, w_fcT, b_fc_p)

    return out[:B, :num_class]


if __name__ == "__main__":
    # Small shapes consistent with the forward pass:
    #   x: (batch=2, channels=4, spatial=16x16) NCHW images
    #   encoder feature dim = 2048 (required by fc), num_class = 10
    B, C, H, W = 2, 4, 16, 16
    num_class = 10

    key = jax.random.PRNGKey(0)
    kx, kwe, kwf, kbf = jax.random.split(key, 4)

    x = jax.random.normal(kx, (B, C, H, W), dtype=jnp.float32)
    # deterministic parameter init (synthetic; no checkpoint loading)
    w_enc = jax.random.normal(kwe, (C, FEATURE_DIM), dtype=jnp.float32) * 0.05
    w_fc = jax.random.normal(kwf, (num_class, FEATURE_DIM), dtype=jnp.float32) * 0.02
    b_fc = jax.random.normal(kbf, (num_class,), dtype=jnp.float32) * 0.01

    params = prepare_params(w_enc, w_fc, b_fc)   # one-time prep; reuse across forwards
    out = net_forward(x, params)
    jax.block_until_ready(out)
    assert out.shape == (B, num_class)

    # Shared f32 reference pieces (pool -> projection -> ReLU).
    HW = H * W
    pooled_ref = jnp.mean(x.reshape(B, C, HW), axis=-1)
    feat_ref = jnp.maximum(pooled_ref @ w_enc, 0.0)

    # Reference 1 (tight): same bf16 quantization points as the kernel
    # (feature cast + fc weight cast), f32 math elsewhere.
    feat_q = feat_ref.astype(jnp.bfloat16).astype(jnp.float32)
    wfq = w_fc.astype(jnp.bfloat16).astype(jnp.float32)
    out_ref_q = jnp.dot(feat_q, wfq.T, precision=lax.Precision.HIGHEST) + b_fc
    assert jnp.allclose(out, out_ref_q, atol=2e-3, rtol=2e-2)

    # Reference 2 (loose): full-f32 module semantics.
    out_ref = feat_ref @ w_fc.T + b_fc
    assert jnp.allclose(out, out_ref, atol=5e-3, rtol=5e-2)

    print("KERNEL_OK")
</pallas_src>

<mosaic_0001>
module attributes {stable_mosaic.version = 11 : i64} {
  func.func @net_kernel(%arg0: i32, %arg1: memref<8x4x256xf32, #tpu.memory_space<vmem>>, %arg2: memref<4x2048xf32, #tpu.memory_space<vmem>>, %arg3: memref<2048x128xbf16, #tpu.memory_space<vmem>>, %arg4: memref<1x128xf32, #tpu.memory_space<vmem>>, %arg5: memref<8x128xf32, #tpu.memory_space<vmem>>) attributes {dimension_semantics = [#tpu.dimension_semantics<parallel>], iteration_bounds = array<i64: 1>, scalar_prefetch = 0 : i64, scratch_operands = 0 : i64, tpu.core_type = #tpu.core_type<tc>, window_params = [{transform_indices = @transform_0, window_bounds = array<i64: 8, 4, 256>}, {pipeline_mode = #tpu.pipeline_mode<synchronous>, transform_indices = @transform_1, window_bounds = array<i64: 4, 2048>}, {pipeline_mode = #tpu.pipeline_mode<synchronous>, transform_indices = @transform_2, window_bounds = array<i64: 2048, 128>}, {pipeline_mode = #tpu.pipeline_mode<synchronous>, transform_indices = @transform_3, window_bounds = array<i64: 1, 128>}, {transform_indices = @transform_4, window_bounds = array<i64: 8, 128>}]} {
    %c0 = arith.constant 0 : index
    %c0_0 = arith.constant 0 : index
    %c0_1 = arith.constant 0 : index
    %0 = vector.load %arg1[%c0, %c0_0, %c0_1] : memref<8x4x256xf32, #tpu.memory_space<vmem>>, vector<8x4x256xf32>
    %cst = arith.constant dense<0.000000e+00> : vector<8x4xf32>
    %1 = vector.multi_reduction <add>, %0, %cst [2] : vector<8x4x256xf32> to vector<8x4xf32>
    %cst_2 = arith.constant 3.906250e-03 : f32
    %2 = vector.broadcast %cst_2 : f32 to vector<8x4xf32>
    %3 = arith.mulf %1, %2 : vector<8x4xf32>
    %c0_3 = arith.constant 0 : index
    %c0_4 = arith.constant 0 : index
    %4 = vector.load %arg2[%c0_3, %c0_4] : memref<4x2048xf32, #tpu.memory_space<vmem>>, vector<4x2048xf32>
    %cst_5 = arith.constant dense<0.000000e+00> : vector<8x2048xf32>
    %5 = tpu.matmul %3, %4, %cst_5 {dimension_numbers = #tpu.dot_dimension_numbers<[1], [0], [0], [1], [0, 0, 1, 1], [], []>} : vector<8x4xf32>, vector<4x2048xf32>, vector<8x2048xf32> -> vector<8x2048xf32>
    %cst_6 = arith.constant 0.000000e+00 : f32
    %6 = vector.broadcast %cst_6 : f32 to vector<8x2048xf32>
    %7 = arith.maximumf %5, %6 : vector<8x2048xf32>
    %8 = arith.truncf %7 : vector<8x2048xf32> to vector<8x2048xbf16>
    %c0_7 = arith.constant 0 : index
    %c0_8 = arith.constant 0 : index
    %9 = vector.load %arg3[%c0_7, %c0_8] : memref<2048x128xbf16, #tpu.memory_space<vmem>>, vector<2048x128xbf16>
    %cst_9 = arith.constant dense<0.000000e+00> : vector<8x128xf32>
    %10 = tpu.matmul %8, %9, %cst_9 {dimension_numbers = #tpu.dot_dimension_numbers<[1], [0], [0], [1], [0, 0, 1, 1], [], []>} : vector<8x2048xbf16>, vector<2048x128xbf16>, vector<8x128xf32> -> vector<8x128xf32>
    %c0_10 = arith.constant 0 : index
    %c0_11 = arith.constant 0 : index
    %11 = vector.load %arg4[%c0_10, %c0_11] : memref<1x128xf32, #tpu.memory_space<vmem>>, vector<1x128xf32>
    %12 = vector.broadcast %11 : vector<1x128xf32> to vector<8x128xf32>
    %13 = arith.addf %10, %12 : vector<8x128xf32>
    %c0_12 = arith.constant 0 : index
    %c0_13 = arith.constant 0 : index
    %14 = vector.load %arg5[%c0_12, %c0_13] : memref<8x128xf32, #tpu.memory_space<vmem>>, vector<8x128xf32>
    tpu.vector_store %arg5[%c0_12, %c0_13], %13 {strides = array<i32>} : memref<8x128xf32, #tpu.memory_space<vmem>>, vector<8x128xf32>,
    return
  }
  func.func @transform_0(%arg0: i32) -> (i32, i32, i32) {
    %c0_i32 = arith.constant 0 : i32
    %c0_i32_0 = arith.constant 0 : i32
    %c0_i32_1 = arith.constant 0 : i32
    return %arg0, %c0_i32, %c0_i32_0 : i32, i32, i32
  }
  func.func @transform_1(%arg0: i32) -> (i32, i32) {
    %c0_i32 = arith.constant 0 : i32
    %c0_i32_0 = arith.constant 0 : i32
    %c0_i32_1 = arith.constant 0 : i32
    return %c0_i32, %c0_i32_0 : i32, i32
  }
  func.func @transform_2(%arg0: i32) -> (i32, i32) {
    %c0_i32 = arith.constant 0 : i32
    %c0_i32_0 = arith.constant 0 : i32
    %c0_i32_1 = arith.constant 0 : i32
    return %c0_i32, %c0_i32_0 : i32, i32
  }
  func.func @transform_3(%arg0: i32) -> (i32, i32) {
    %c0_i32 = arith.constant 0 : i32
    %c0_i32_0 = arith.constant 0 : i32
    %c0_i32_1 = arith.constant 0 : i32
    return %c0_i32, %c0_i32_0 : i32, i32
  }
  func.func @transform_4(%arg0: i32) -> (i32, i32) {
    %c0_i32 = arith.constant 0 : i32
    %c0_i32_0 = arith.constant 0 : i32
    return %arg0, %c0_i32 : i32, i32
  }
}

</mosaic_0001>

<bundles_post_ra>
// kernel: tpu_custom_call.1
= control target key start
LH: loop header
LB: loop body
LE: loop exit
PB: predicated region body
PF: predicated region fallthrough
CT: control target
= control target key end

     0   :  { %9 = vsyncpa [#allocation3], 0  ;;  %s2767_s0 = inlined_call_operand.hbm [shape: f32[8,4,256], index: 0, kind: input, shape index: {}]   ;;  %s2768_s1 = inlined_call_operand.hbm [shape: f32[4,2048], index: 1, kind: input, shape index: {}]   ;;  %s2769_s2 = inlined_call_operand.hbm [shape: bf16[2048,128], index: 2, kind: input, shape index: {}]   ;;  %s2770_s3 = inlined_call_operand.vmem [shape: f32[1,128], index: 3, kind: input, shape index: {}]   ;;  %s2771_s4 = inlined_call_operand.hbm [shape: f32[8,128], index: 4, kind: output, shape index: {}]  }
   0x1   :  { %10 = vsyncpa [#allocation6], 0  ;;  %s30_s17 = sshll.u32 %s2768_s1, 4  ;;  %s31_s17 = int_to_ptr.hbm [resolvable:$true] %s30_s17 }
   0x2   :  { %11 = vsyncpa [#allocation4], 0  ;;  %s2671_s18 = smov [#allocation5]   ;;  %s16_s22 = sshll.u32 %s2767_s0, 4  ;;  %s17_s22 = int_to_ptr.hbm [resolvable:$true] %s16_s22 }
   0x3   :  { %s32_s19 = sshll.u32 %s2671_s18, 4  ;;  %s2672_s23 = smov [#allocation2]   ;;  %s33_s19 = int_to_ptr.vmem [resolvable:$true] %s32_s19 }
   0x4   :  { %35 = dma.hbm_to_vmem [thread:$0]  %s31_s17, 1024, %s33_s19, [#allocation6]  }
   0x5   :  { %s18_s24 = sshll.u32 %s2672_s23, 4  ;;  %s2673_s25 = smov 128   ;;  %s19_s24 = int_to_ptr.vmem [resolvable:$true] %s18_s24 }
   0x6   :  { %s2674_s26 = smov 8   ;;  %s40_s1 = sshll.u32 %s2769_s2, 4  ;;  %s41_s1 = int_to_ptr.hbm [resolvable:$true] %s40_s1 }
   0x7   :  { %24 = dma.hbm_to_vmem [thread:$0]  %s17_s22, 1024, %s19_s24, [#allocation3], %s2673_s25, %s2673_s25, %s2674_s26  }
   0x8   :  { %s2675_s29 = smov [#allocation7]   ;;  %s2676_s5 = smov 64  }
   0x9   :  { %s42_s30 = sshll.u32 %s2675_s29, 4  ;;  %s2677_s6 = smov 4   ;;  %s43_s30 = int_to_ptr.vmem [resolvable:$true] %s42_s30 }
   0xa   :  { %48 = dma.hbm_to_vmem [thread:$0]  %s41_s1, 16384, %s43_s30, [#allocation6], %s2676_s5, %s2676_s5, %s2677_s6  }
   0xb   :  { %2665 = dma.done.wait [#allocation3], 1024  }
   0xc   :  { %2666 = vsyncadd [#allocation3], 4294966272 }
   0xd   :  { %2667 = dma.done.wait [#allocation6], 17408  }
   0xe   :  { %2668 = vsyncadd [#allocation6], 4294949888  ;;  %v63_v0 = vld [vmem:[#allocation2] sm:$0xff]  ;;  %v65_v1 = vld [vmem:[#allocation2 + $0x10] sm:$0xff]  ;;  %vm122_vm0 = vcmask 1043456   ;;  %vm197_vm1 = vcmask 1041409  }
   0xf   :  { %79 = vst [vmem:[#allocation1] ss:$2 sm:$0xff] %v63_v0  ;;  %v64_v2 = vld [vmem:[#allocation2 + $0x8] sm:$0xff]  ;;  %v66_v3 = vld [vmem:[#allocation2 + $0x18] sm:$0xff]  ;;  %v67_v4 = vld [vmem:[#allocation2 + $0x20] sm:$0xff]  ;;  %vm199_vm2 = vcmask 1042434  }
  0x10   :  { %87 = vst [vmem:[#allocation1 + $0x20] ss:$2 sm:$0xff] %v65_v1  ;;  %v69_v5 = vld [vmem:[#allocation2 + $0x30] sm:$0xff]  ;;  %v68_v10 = vld [vmem:[#allocation2 + $0x28] sm:$0xff]  ;;  %v70_v16 = vld [vmem:[#allocation2 + $0x38] sm:$0xff]  ;;  %vm201_vm3 = vcmask 1043459  }
  0x11   :  { %83 = vst [vmem:[#allocation1 + $0x10] ss:$2 sm:$0xff] %v64_v2  ;;  %v171_v22 = vld [vmem:[#allocation5] sm:$0xff]  ;;  %v173_v27 = vld [vmem:[#allocation5 + $0x10] sm:$0xff]  ;;  %v172_v33 = vld [vmem:[#allocation5 + $0x8] sm:$0xff]  ;;  %v187_v2 = vlaneseq  ;;  %vm203_vm4 = vcmask 1044484  }
  0x12   :  { %91 = vst [vmem:[#allocation1 + $0x30] ss:$2 sm:$0xff] %v66_v3  ;;  %v174_v38 = vld [vmem:[#allocation5 + $0x18] sm:$0xff]  ;;  %v175_v53 = vld [vmem:[#allocation5 + $0x20] sm:$0xff]  ;;  %v176_v55 = vld [vmem:[#allocation5 + $0x28] sm:$0xff]  ;;  %vm205_vm5 = vcmask 1045509  }
  0x13   :  { %v177_v59 = vld [vmem:[#allocation5 + $0x30] sm:$0xff]  ;;  %v178_v62 = vld [vmem:[#allocation5 + $0x38] sm:$0xff]  ;;  %v188_v3 = vand.u32 127, %v187_v2  ;;  %vm207_vm6 = vcmask 1046534   ;;  %vm209_vm7 = vcmask 1047559   ;;  %vm246_vm8 = vcmask 31744  }
  0x14   :  { %v2441_v2 = vld [vmem:[#allocation7 + $0x48] sm:$0xff]  ;;  %s1877_s10 = sshll.u32 %s2771_s4, 4  ;;  %s1878_s10 = int_to_ptr.hbm [resolvable:$true] %s1877_s10 }
  0x16   :  { %v80_v6 = vld.sshfl [vmem:[#allocation1] sm:$0xff pattern:$0x75316420]  ;;  %v81_v7 = vld.sshfl [vmem:[#allocation1 + $0x8] sm:$0xff pattern:$0x75316420] }
  0x17   :  { %v123_v8 = vsel %vm122_vm0, %v80_v6, 0.0  ;;  %v124_v9 = vsel %vm122_vm0, %v81_v7, 0.0  ;;  %94 = vst [vmem:[#allocation1] ss:$2 sm:$0xff] %v67_v4 }
  0x18   :  { %v125_v11 = vadd.f32 %v124_v9, %v123_v8  ;;  %v88_v12 = vld.sshfl [vmem:[#allocation1 + $0x20] sm:$0xff pattern:$0x75316420]  ;;  %v89_v13 = vld.sshfl [vmem:[#allocation1 + $0x28] sm:$0xff pattern:$0x75316420] }
  0x19   :  { %v133_v14 = vsel %vm122_vm0, %v88_v12, 0.0  ;;  %v134_v15 = vsel %vm122_vm0, %v89_v13, 0.0  ;;  %100 = vst [vmem:[#allocation1 + $0x20] ss:$2 sm:$0xff] %v69_v5 }
  0x1a   :  { %126 = vadd.xlane.f32.xlu0 %v125_v11  ;;  %v135_v17 = vadd.f32 %v134_v15, %v133_v14  ;;  %v84_v18 = vld.sshfl [vmem:[#allocation1 + $0x10] sm:$0xff pattern:$0x75316420]  ;;  %v85_v19 = vld.sshfl [vmem:[#allocation1 + $0x18] sm:$0xff pattern:$0x75316420] }
  0x1b   :  { %97 = vst [vmem:[#allocation1 + $0x10] ss:$2 sm:$0xff] %v68_v10  ;;  %v128_v20 = vsel %vm122_vm0, %v84_v18, 0.0  ;;  %v129_v21 = vsel %vm122_vm0, %v85_v19, 0.0 }
  0x1c   :  { %136 = vadd.xlane.f32.xlu1 %v135_v17  ;;  %v92_v23 = vld.sshfl [vmem:[#allocation1 + $0x30] sm:$0xff pattern:$0x75316420]  ;;  %v93_v24 = vld.sshfl [vmem:[#allocation1 + $0x38] sm:$0xff pattern:$0x75316420]  ;;  %v130_v28 = vadd.f32 %v129_v21, %v128_v20 }
  0x1d   :  { %103 = vst [vmem:[#allocation1 + $0x30] ss:$2 sm:$0xff] %v70_v16  ;;  %v138_v25 = vsel %vm122_vm0, %v92_v23, 0.0  ;;  %v139_v26 = vsel %vm122_vm0, %v93_v24, 0.0 }
  0x1e   :  { %v95_v29 = vld.sshfl [vmem:[#allocation1] sm:$0xff pattern:$0x75316420]  ;;  %v96_v30 = vld.sshfl [vmem:[#allocation1 + $0x8] sm:$0xff pattern:$0x75316420]  ;;  %v140_v35 = vadd.f32 %v139_v26, %v138_v25 }
  0x1f   :  { %v143_v31 = vsel %vm122_vm0, %v95_v29, 0.0  ;;  %v144_v32 = vsel %vm122_vm0, %v96_v30, 0.0  ;;  %219 = vst [vmem:[#allocation1] ss:$2 sm:$0xff] %v171_v22 }
  0x20   :  { %v145_v34 = vadd.f32 %v144_v32, %v143_v31  ;;  %v101_v36 = vld.sshfl [vmem:[#allocation1 + $0x20] sm:$0xff pattern:$0x75316420]  ;;  %v102_v37 = vld.sshfl [vmem:[#allocation1 + $0x28] sm:$0xff pattern:$0x75316420] }
  0x21   :  { %223 = vst [vmem:[#allocation1 + $0x20] ss:$2 sm:$0xff] %v173_v27  ;;  %v153_v43 = vsel %vm122_vm0, %v101_v36, 0.0  ;;  %v154_v44 = vsel %vm122_vm0, %v102_v37, 0.0 }
  0x22   :  { %131 = vadd.xlane.f32.xlu0 %v130_v28  ;;  %146 = vadd.xlane.f32.xlu2 %v145_v34  ;;  %v98_v39 = vld.sshfl [vmem:[#allocation1 + $0x10] sm:$0xff pattern:$0x75316420]  ;;  %v99_v40 = vld.sshfl [vmem:[#allocation1 + $0x18] sm:$0xff pattern:$0x75316420]  ;;  %v155_v50 = vadd.f32 %v154_v44, %v153_v43 }
  0x23   :  { %v148_v41 = vsel %vm122_vm0, %v98_v39, 0.0  ;;  %v149_v42 = vsel %vm122_vm0, %v99_v40, 0.0  ;;  %221 = vst [vmem:[#allocation1 + $0x10] ss:$2 sm:$0xff] %v172_v33  ;;  %v2455_v43 = vld [vmem:[#allocation7 + $0xb8] sm:$0xff] }
  0x24   :  { %141 = vadd.xlane.f32.xlu1 %v140_v35  ;;  %v104_v45 = vld.sshfl [vmem:[#allocation1 + $0x30] sm:$0xff pattern:$0x75316420]  ;;  %v105_v46 = vld.sshfl [vmem:[#allocation1 + $0x38] sm:$0xff pattern:$0x75316420]  ;;  %v150_v49 = vadd.f32 %v149_v42, %v148_v41 }
  0x25   :  { %v158_v47 = vsel %vm122_vm0, %v104_v45, 0.0  ;;  %v159_v48 = vsel %vm122_vm0, %v105_v46, 0.0  ;;  %225 = vst [vmem:[#allocation1 + $0x30] ss:$2 sm:$0xff] %v174_v38  ;;  %v2439_v41 = vld [vmem:[#allocation7 + $0x38] sm:$0xff]  ;;  %v2438_v45 = vld [vmem:[#allocation7 + $0x30] sm:$0xff] }
  0x26   :  { %v160_v51 = vadd.f32 %v159_v48, %v158_v47  ;;  %v226_v52 = vld.sshfl [vmem:[#allocation1] sm:$0xff pattern:$0x75316420]  ;;  %v227_v54 = vld.sshfl [vmem:[#allocation1 + $0x8] sm:$0xff pattern:$0x75316420] }
  0x27   :  { %1888 = vmatpush.msk.msra.mxu0 %vm122_vm0, %v226_v52  ;;  %234 = vst [vmem:[#allocation1] ss:$2 sm:$0xff] %v175_v53  ;;  %1890 = vmatpush.msk.msra.mxu1 %vm122_vm0, %v227_v54  ;;  %v2447_v42 = vld [vmem:[#allocation7 + $0x78] sm:$0xff]  ;;  %v2446_v46 = vld [vmem:[#allocation7 + $0x70] sm:$0xff]  ;;  %v2461_v52 = vld [vmem:[#allocation7 + $0xe8] sm:$0xff] }
  0x28   :  { %v230_v58 = vld.sshfl [vmem:[#allocation1 + $0x20] sm:$0xff pattern:$0x75316420]  ;;  %v231_v60 = vld.sshfl [vmem:[#allocation1 + $0x28] sm:$0xff pattern:$0x75316420] }
  0x29   :  { %1896 = vmatpush.msk.msrb.mxu0 %vm122_vm0, %v230_v58  ;;  %236 = vst [vmem:[#allocation1 + $0x20] ss:$2 sm:$0xff] %v177_v59  ;;  %1898 = vmatpush.msk.msrb.mxu1 %vm122_vm0, %v231_v60  ;;  %v2463_v44 = vld [vmem:[#allocation7 + $0xf8] sm:$0xff]  ;;  %v2454_v47 = vld [vmem:[#allocation7 + $0xb0] sm:$0xff]  ;;  %v2436_v53 = vld [vmem:[#allocation7 + $0x20] sm:$0xff] }
  0x2a   :  { %151 = vadd.xlane.f32.xlu2 %v150_v49  ;;  %156 = vadd.xlane.f32.xlu0 %v155_v50  ;;  %v228_v56 = vld.sshfl [vmem:[#allocation1 + $0x10] sm:$0xff pattern:$0x75316420]  ;;  %v229_v57 = vld.sshfl [vmem:[#allocation1 + $0x18] sm:$0xff pattern:$0x75316420] }
  0x2b   :  { %1892 = vmatpush.msk.msra.mxu2 %vm122_vm0, %v228_v56  ;;  %235 = vst [vmem:[#allocation1 + $0x10] ss:$2 sm:$0xff] %v176_v55  ;;  %1894 = vmatpush.msk.msra.mxu3 %vm122_vm0, %v229_v57  ;;  %v2462_v48 = vld [vmem:[#allocation7 + $0xf0] sm:$0xff]  ;;  %v2437_v49 = vld [vmem:[#allocation7 + $0x28] sm:$0xff]  ;;  %v2444_v54 = vld [vmem:[#allocation7 + $0x60] sm:$0xff] }
  0x2c   :  { %161 = vadd.xlane.f32.xlu1 %v160_v51  ;;  %v232_v61 = vld.sshfl [vmem:[#allocation1 + $0x30] sm:$0xff pattern:$0x75316420]  ;;  %v233_v63 = vld.sshfl [vmem:[#allocation1 + $0x38] sm:$0xff pattern:$0x75316420] }
  0x2d   :  { %1900 = vmatpush.msk.msrb.mxu2 %vm122_vm0, %v232_v61  ;;  %237 = vst [vmem:[#allocation1 + $0x30] ss:$2 sm:$0xff] %v178_v62  ;;  %1902 = vmatpush.msk.msrb.mxu3 %vm122_vm0, %v233_v63  ;;  %v2445_v50 = vld [vmem:[#allocation7 + $0x68] sm:$0xff]  ;;  %v2452_v55 = vld [vmem:[#allocation7 + $0xa0] sm:$0xff]  ;;  %v2435_v57 = vld [vmem:[#allocation7 + $0x18] sm:$0xff] }
  0x2e   :  { %v238_v33 = vld.sshfl [vmem:[#allocation1] sm:$0xff pattern:$0x75316420]  ;;  %v239_v34 = vld.sshfl [vmem:[#allocation1 + $0x8] sm:$0xff pattern:$0x75316420] }
  0x2f   :  { %v2453_v51 = vld [vmem:[#allocation7 + $0xa8] sm:$0xff]  ;;  %v2460_v56 = vld [vmem:[#allocation7 + $0xe0] sm:$0xff]  ;;  %v2443_v58 = vld [vmem:[#allocation7 + $0x58] sm:$0xff] }
  0x30   :  { %v242_v37 = vld.sshfl [vmem:[#allocation1 + $0x20] sm:$0xff pattern:$0x75316420]  ;;  %v243_v38 = vld.sshfl [vmem:[#allocation1 + $0x28] sm:$0xff pattern:$0x75316420] }
  0x31   :  { %v2451_v59 = vld [vmem:[#allocation7 + $0x98] sm:$0xff]  ;;  %v2434_v61 = vld [vmem:[#allocation7 + $0x10] sm:$0xff] }
  0x32   :  { %v240_v35 = vld.sshfl [vmem:[#allocation1 + $0x10] sm:$0xff pattern:$0x75316420]  ;;  %v241_v36 = vld.sshfl [vmem:[#allocation1 + $0x18] sm:$0xff pattern:$0x75316420] }
  0x33   :  { %v2459_v60 = vld [vmem:[#allocation7 + $0xd8] sm:$0xff]  ;;  %v2442_v62 = vld [vmem:[#allocation7 + $0x50] sm:$0xff] }
  0x34   :  { %v244_v39 = vld.sshfl [vmem:[#allocation1 + $0x30] sm:$0xff pattern:$0x75316420]  ;;  %v245_v40 = vld.sshfl [vmem:[#allocation1 + $0x38] sm:$0xff pattern:$0x75316420] }
  0x35   :  { %v2450_v63 = vld [vmem:[#allocation7 + $0x90] sm:$0xff] }
  0x8d   :  { %v127_v0 = vpop.xlane.xlu0 %126 }
  0x8e   :  { %v163_v4 = vmul.f32 0.00390625, %v127_v0  ;;  %v2458_v0 = vld [vmem:[#allocation7 + $0xd0] sm:$0xff] }
  0x8f   :  { %v137_v1 = vpop.xlane.xlu1 %136 }
  0x90   :  { %v165_v5 = vmul.f32 0.00390625, %v137_v1  ;;  %v189_v10 = vperm.slane %v163_v4, %v188_v3  ;;  %v2433_v1 = vld [vmem:[#allocation7 + $0x8] sm:$0xff] }
  0x91   :  { %v2457_v4 = vld [vmem:[#allocation7 + $0xc8] sm:$0xff] }
  0x92   :  { %v191_v13 = vperm.slane %v165_v5, %v188_v3  ;;  %v2432_v5 = vld [vmem:[#allocation7] sm:$0xff] }
  0x95   :  { %v132_v6 = vpop.xlane.xlu0 %131  ;;  %v147_v7 = vpop.xlane.xlu2 %146 }
  0x96   :  { %v164_v8 = vmul.f32 0.00390625, %v132_v6  ;;  %v167_v16 = vmul.f32 0.00390625, %v147_v7  ;;  %v2440_v6 = vld [vmem:[#allocation7 + $0x40] sm:$0xff]  ;;  %v2471_v7 = vld [vmem:[#allocation7 + $0x138] sm:$0xff] }
  0x97   :  { %v142_v9 = vpop.xlane.xlu1 %141 }
  0x98   :  { %v190_v11 = vperm.slane %v164_v8, %v188_v3  ;;  %v166_v12 = vmul.f32 0.00390625, %v142_v9  ;;  %v193_v23 = vperm.slane %v167_v16, %v188_v3  ;;  %v2479_v8 = vld [vmem:[#allocation7 + $0x178] sm:$0xff]  ;;  %v2448_v9 = vld [vmem:[#allocation7 + $0x80] sm:$0xff]  ;;  %v2494_v16 = vld [vmem:[#allocation7 + $0x1f0] sm:$0xff] }
  0x9a   :  { %v198_v14 = vsel %vm197_vm1, %v190_v11, %v189_v10  ;;  %v192_v15 = vperm.slane %v166_v12, %v188_v3  ;;  %v2456_v10 = vld [vmem:[#allocation7 + $0xc0] sm:$0xff]  ;;  %v2487_v11 = vld [vmem:[#allocation7 + $0x1b8] sm:$0xff] }
  0x9b   :  { %v200_v17 = vsel %vm199_vm2, %v191_v13, %v198_v14  ;;  %v2495_v12 = vld [vmem:[#allocation7 + $0x1f8] sm:$0xff]  ;;  %v2470_v13 = vld [vmem:[#allocation7 + $0x130] sm:$0xff] }
  0x9c   :  { %v202_v20 = vsel %vm201_vm3, %v192_v15, %v200_v17  ;;  %v2478_v14 = vld [vmem:[#allocation7 + $0x170] sm:$0xff]  ;;  %v2469_v17 = vld [vmem:[#allocation7 + $0x128] sm:$0xff] }
  0x9d   :  { %v152_v18 = vpop.xlane.xlu2 %151  ;;  %v157_v19 = vpop.xlane.xlu0 %156  ;;  %v204_v28 = vsel %vm203_vm4, %v193_v23, %v202_v20  ;;  %v2486_v15 = vld [vmem:[#allocation7 + $0x1b0] sm:$0xff]  ;;  %v2493_v20 = vld [vmem:[#allocation7 + $0x1e8] sm:$0xff]  ;;  %v2484_v23 = vld [vmem:[#allocation7 + $0x1a0] sm:$0xff] }
  0x9e   :  { %v168_v21 = vmul.f32 0.00390625, %v152_v18  ;;  %v169_v22 = vmul.f32 0.00390625, %v157_v19  ;;  %v2477_v18 = vld [vmem:[#allocation7 + $0x168] sm:$0xff] }
  0x9f   :  { %v162_v24 = vpop.xlane.xlu1 %161  ;;  %v2485_v19 = vld [vmem:[#allocation7 + $0x1a8] sm:$0xff] }
  0xa0   :  { %v194_v25 = vperm.slane %v168_v21, %v188_v3  ;;  %v195_v26 = vperm.slane %v169_v22, %v188_v3  ;;  %v170_v27 = vmul.f32 0.00390625, %v162_v24  ;;  %v2468_v21 = vld [vmem:[#allocation7 + $0x120] sm:$0xff] }
  0xa1   :  { %v2476_v22 = vld [vmem:[#allocation7 + $0x160] sm:$0xff] }
  0xa2   :  { %v206_v29 = vsel %vm205_vm5, %v194_v25, %v204_v28  ;;  %v196_v30 = vperm.slane %v170_v27, %v188_v3  ;;  %v2449_v3 = vld [vmem:[#allocation7 + $0x88] sm:$0xff]  ;;  %v2492_v24 = vld [vmem:[#allocation7 + $0x1e0] sm:$0xff]  ;;  %v2467_v25 = vld [vmem:[#allocation7 + $0x118] sm:$0xff] }
  0xa3   :  { %v208_v31 = vsel %vm207_vm6, %v195_v26, %v206_v29  ;;  %v2475_v26 = vld [vmem:[#allocation7 + $0x158] sm:$0xff]  ;;  %v2466_v29 = vld [vmem:[#allocation7 + $0x110] sm:$0xff] }
  0xa4   :  { %v210_v32 = vsel %vm209_vm7, %v196_v30, %v208_v31  ;;  %v2483_v27 = vld [vmem:[#allocation7 + $0x198] sm:$0xff]  ;;  %v2474_v30 = vld [vmem:[#allocation7 + $0x150] sm:$0xff]  ;;  %v2465_v31 = vld [vmem:[#allocation7 + $0x108] sm:$0xff] }
  0xa5   :  { %1889 = vmatmul.msk.f32.vlgmr.msra.gmra.mxu0 %vm246_vm8, %v210_v32  ;;  %1891 = vmatmul.msk.f32.vlgmr.msra.gmra.mxu1 %vm246_vm8, %v210_v32  ;;  %v2491_v28 = vld [vmem:[#allocation7 + $0x1d8] sm:$0xff] }
  0xa6   :  { %1893 = vmatmul.msk.f32.vlgmr.msra.gmra.mxu2 %vm246_vm8, %v210_v32  ;;  %1895 = vmatmul.msk.f32.vlgmr.msra.gmra.mxu3 %vm246_vm8, %v210_v32 }
  0xa7   :  { %1904 = vmatpush.msk.msra.mxu0 %vm122_vm0, %v238_v33  ;;  %1906 = vmatpush.msk.msra.mxu1 %vm122_vm0, %v239_v34  ;;  %v2482_v33 = vld [vmem:[#allocation7 + $0x190] sm:$0xff] }
  0xa8   :  { %1908 = vmatpush.msk.msra.mxu2 %vm122_vm0, %v240_v35  ;;  %1910 = vmatpush.msk.msra.mxu3 %vm122_vm0, %v241_v36  ;;  %v2490_v34 = vld [vmem:[#allocation7 + $0x1d0] sm:$0xff]  ;;  %v2464_v35 = vld [vmem:[#allocation7 + $0x100] sm:$0xff] }
  0xa9   :  { %v2472_v36 = vld [vmem:[#allocation7 + $0x140] sm:$0xff] }
  0xad   :  { %1897 = vmatmul.msk.f32.vlgmr.msrb.gmra.mxu0 %vm246_vm8, %v210_v32  ;;  %1899 = vmatmul.msk.f32.vlgmr.msrb.gmra.mxu1 %vm246_vm8, %v210_v32 }
  0xae   :  { %1901 = vmatmul.msk.f32.vlgmr.msrb.gmra.mxu2 %vm246_vm8, %v210_v32  ;;  %1903 = vmatmul.msk.f32.vlgmr.msrb.gmra.mxu3 %vm246_vm8, %v210_v32 }
  0xaf   :  { %1912 = vmatpush.msk.msrb.mxu0 %vm122_vm0, %v242_v37  ;;  %1914 = vmatpush.msk.msrb.mxu1 %vm122_vm0, %v243_v38  ;;  %v2481_v37 = vld [vmem:[#allocation7 + $0x188] sm:$0xff] }
  0xb0   :  { %1916 = vmatpush.msk.msrb.mxu2 %vm122_vm0, %v244_v39  ;;  %1918 = vmatpush.msk.msrb.mxu3 %vm122_vm0, %v245_v40  ;;  %v2489_v38 = vld [vmem:[#allocation7 + $0x1c8] sm:$0xff]  ;;  %v2480_v39 = vld [vmem:[#allocation7 + $0x180] sm:$0xff] }
  0xb1   :  { %v2488_v40 = vld [vmem:[#allocation7 + $0x1c0] sm:$0xff] }
  0xb5   :  { %1905 = vmatmul.msk.f32.vlgmr.msra.gmra.mxu0 %vm246_vm8, %v210_v32  ;;  %1907 = vmatmul.msk.f32.vlgmr.msra.gmra.mxu1 %vm246_vm8, %v210_v32 }
  0xb6   :  { %1909 = vmatmul.msk.f32.vlgmr.msra.gmra.mxu2 %vm246_vm8, %v210_v32  ;;  %1911 = vmatmul.msk.f32.vlgmr.msra.gmra.mxu3 %vm246_vm8, %v210_v32 }
  0xb7   :  { %1661 = vmatpush.bf16.msra.mxu0 %v2439_v41  ;;  %1674 = vmatpush.bf16.msra.mxu1 %v2447_v42 }
  0xb8   :  { %1687 = vmatpush.bf16.msra.mxu2 %v2455_v43  ;;  %1700 = vmatpush.bf16.msra.mxu3 %v2463_v44 }
  0xbb   :  { %1662 = vmatpush.bf16.msra.mxu0 %v2438_v45  ;;  %1675 = vmatpush.bf16.msra.mxu1 %v2446_v46  ;;  %v2503_v45 = vld [vmem:[#allocation7 + $0x238] sm:$0xff] }
  0xbc   :  { %1688 = vmatpush.bf16.msra.mxu2 %v2454_v47  ;;  %1701 = vmatpush.bf16.msra.mxu3 %v2462_v48  ;;  %v2511_v46 = vld [vmem:[#allocation7 + $0x278] sm:$0xff] }
  0xbd   :  { %1913 = vmatmul.msk.f32.vlgmr.msrb.gmra.mxu0 %vm246_vm8, %v210_v32  ;;  %1915 = vmatmul.msk.f32.vlgmr.msrb.gmra.mxu1 %vm246_vm8, %v210_v32 }
  0xbe   :  { %1917 = vmatmul.msk.f32.vlgmr.msrb.gmra.mxu2 %vm246_vm8, %v210_v32  ;;  %1919 = vmatmul.msk.f32.vlgmr.msrb.gmra.mxu3 %vm246_vm8, %v210_v32  ;;  %v2473_v32 = vld [vmem:[#allocation7 + $0x148] sm:$0xff] }
  0xbf   :  { %1663 = vmatpush.bf16.msra.mxu0 %v2437_v49  ;;  %1676 = vmatpush.bf16.msra.mxu1 %v2445_v50  ;;  %v2502_v49 = vld [vmem:[#allocation7 + $0x230] sm:$0xff] }
  0xc0   :  { %1689 = vmatpush.bf16.msra.mxu2 %v2453_v51  ;;  %1702 = vmatpush.bf16.msra.mxu3 %v2461_v52  ;;  %v2510_v50 = vld [vmem:[#allocation7 + $0x270] sm:$0xff] }
  0xc3   :  { %1664 = vmatpush.bf16.msra.mxu0 %v2436_v53  ;;  %1677 = vmatpush.bf16.msra.mxu1 %v2444_v54 }
  0xc4   :  { %1690 = vmatpush.bf16.msra.mxu2 %v2452_v55  ;;  %1703 = vmatpush.bf16.msra.mxu3 %v2460_v56  ;;  %v2519_v55 = vld [vmem:[#allocation7 + $0x2b8] sm:$0xff] }
  0xc5   :  { %v2527_v56 = vld [vmem:[#allocation7 + $0x2f8] sm:$0xff] }
  0xc7   :  { %1665 = vmatpush.bf16.msra.mxu0 %v2435_v57  ;;  %1678 = vmatpush.bf16.msra.mxu1 %v2443_v58 }
  0xc8   :  { %1691 = vmatpush.bf16.msra.mxu2 %v2451_v59  ;;  %1704 = vmatpush.bf16.msra.mxu3 %v2459_v60  ;;  %v2501_v59 = vld [vmem:[#allocation7 + $0x228] sm:$0xff] }
  0xc9   :  { %v2509_v60 = vld [vmem:[#allocation7 + $0x268] sm:$0xff] }
  0xcb   :  { %1666 = vmatpush.bf16.msra.mxu0 %v2434_v61  ;;  %1679 = vmatpush.bf16.msra.mxu1 %v2442_v62 }
  0xcc   :  { %1692 = vmatpush.bf16.msra.mxu2 %v2450_v63  ;;  %1705 = vmatpush.bf16.msra.mxu3 %v2458_v0  ;;  %v2518_v63 = vld [vmem:[#allocation7 + $0x2b0] sm:$0xff] }
  0xcd   :  { %v2526_v0 = vld [vmem:[#allocation7 + $0x2f0] sm:$0xff] }
  0xcf   :  { %1667 = vmatpush.bf16.msra.mxu0 %v2433_v1  ;;  %1680 = vmatpush.bf16.msra.mxu1 %v2441_v2  ;;  %v2500_v1 = vld [vmem:[#allocation7 + $0x220] sm:$0xff] }
  0xd0   :  { %1693 = vmatpush.bf16.msra.mxu2 %v2449_v3  ;;  %1706 = vmatpush.bf16.msra.mxu3 %v2457_v4  ;;  %v2508_v2 = vld [vmem:[#allocation7 + $0x260] sm:$0xff] }
  0xd3   :  { %1668 = vmatpush.bf16.msra.mxu0 %v2432_v5  ;;  %1681 = vmatpush.bf16.msra.mxu1 %v2440_v6  ;;  %v2517_v5 = vld [vmem:[#allocation7 + $0x2a8] sm:$0xff] }
  0xd4   :  { %1694 = vmatpush.bf16.msra.mxu2 %v2448_v9  ;;  %1707 = vmatpush.bf16.msra.mxu3 %v2456_v10  ;;  %v2525_v6 = vld [vmem:[#allocation7 + $0x2e8] sm:$0xff]  ;;  %v2499_v9 = vld [vmem:[#allocation7 + $0x218] sm:$0xff] }
  0xd5   :  { %v2507_v10 = vld [vmem:[#allocation7 + $0x258] sm:$0xff] }
  0xd7   :  { %1713 = vmatpush.bf16.msrb.mxu0 %v2471_v7  ;;  %1726 = vmatpush.bf16.msrb.mxu1 %v2479_v8 }
  0xd8   :  { %1739 = vmatpush.bf16.msrb.mxu2 %v2487_v11  ;;  %1752 = vmatpush.bf16.msrb.mxu3 %v2495_v12 }
  0xdb   :  { %1714 = vmatpush.bf16.msrb.mxu0 %v2470_v13  ;;  %1727 = vmatpush.bf16.msrb.mxu1 %v2478_v14  ;;  %v2516_v13 = vld [vmem:[#allocation7 + $0x2a0] sm:$0xff] }
  0xdc   :  { %1740 = vmatpush.bf16.msrb.mxu2 %v2486_v15  ;;  %1753 = vmatpush.bf16.msrb.mxu3 %v2494_v16  ;;  %v2524_v14 = vld [vmem:[#allocation7 + $0x2e0] sm:$0xff] }
  0xdf   :  { %1715 = vmatpush.bf16.msrb.mxu0 %v2469_v17  ;;  %1728 = vmatpush.bf16.msrb.mxu1 %v2477_v18  ;;  %v2498_v17 = vld [vmem:[#allocation7 + $0x210] sm:$0xff] }
  0xe0   :  { %1741 = vmatpush.bf16.msrb.mxu2 %v2485_v19  ;;  %1754 = vmatpush.bf16.msrb.mxu3 %v2493_v20  ;;  %v2506_v18 = vld [vmem:[#allocation7 + $0x250] sm:$0xff]  ;;  %v2515_v19 = vld [vmem:[#allocation7 + $0x298] sm:$0xff] }
  0xe1   :  { %v2523_v20 = vld [vmem:[#allocation7 + $0x2d8] sm:$0xff] }
  0xe3   :  { %1716 = vmatpush.bf16.msrb.mxu0 %v2468_v21  ;;  %1729 = vmatpush.bf16.msrb.mxu1 %v2476_v22 }
  0xe4   :  { %1742 = vmatpush.bf16.msrb.mxu2 %v2484_v23  ;;  %1755 = vmatpush.bf16.msrb.mxu3 %v2492_v24  ;;  %v2497_v23 = vld [vmem:[#allocation7 + $0x208] sm:$0xff] }
  0xe5   :  { %v2505_v24 = vld [vmem:[#allocation7 + $0x248] sm:$0xff] }
  0xe7   :  { %1717 = vmatpush.bf16.msrb.mxu0 %v2467_v25  ;;  %1730 = vmatpush.bf16.msrb.mxu1 %v2475_v26 }
  0xe8   :  { %1743 = vmatpush.bf16.msrb.mxu2 %v2483_v27  ;;  %1756 = vmatpush.bf16.msrb.mxu3 %v2491_v28  ;;  %v2514_v27 = vld [vmem:[#allocation7 + $0x290] sm:$0xff] }
  0xe9   :  { %v2522_v28 = vld [vmem:[#allocation7 + $0x2d0] sm:$0xff] }
  0xeb   :  { %1718 = vmatpush.bf16.msrb.mxu0 %v2466_v29  ;;  %1731 = vmatpush.bf16.msrb.mxu1 %v2474_v30  ;;  %v2496_v29 = vld [vmem:[#allocation7 + $0x200] sm:$0xff] }
  0xec   :  { %1744 = vmatpush.bf16.msrb.mxu2 %v2482_v33  ;;  %1757 = vmatpush.bf16.msrb.mxu3 %v2490_v34  ;;  %v2504_v30 = vld [vmem:[#allocation7 + $0x240] sm:$0xff]  ;;  %v2535_v33 = vld [vmem:[#allocation7 + $0x338] sm:$0xff] }
  0xed   :  { %v2543_v34 = vld [vmem:[#allocation7 + $0x378] sm:$0xff] }
  0xef   :  { %1719 = vmatpush.bf16.msrb.mxu0 %v2465_v31  ;;  %1732 = vmatpush.bf16.msrb.mxu1 %v2473_v32 }
  0xf0   :  { %1745 = vmatpush.bf16.msrb.mxu2 %v2481_v37  ;;  %1758 = vmatpush.bf16.msrb.mxu3 %v2489_v38 }
  0xf3   :  { %1720 = vmatpush.bf16.msrb.mxu0 %v2464_v35  ;;  %1733 = vmatpush.bf16.msrb.mxu1 %v2472_v36  ;;  %v2513_v35 = vld [vmem:[#allocation7 + $0x288] sm:$0xff] }
  0xf4   :  { %1746 = vmatpush.bf16.msrb.mxu2 %v2480_v39  ;;  %1759 = vmatpush.bf16.msrb.mxu3 %v2488_v40  ;;  %v2521_v36 = vld [vmem:[#allocation7 + $0x2c8] sm:$0xff] }
 0x122   :  { %v298_v41 = vpop.f32.mrf.mxu0  ;;  %v318_v42 = vpop.f32.mrf.mxu1 }
 0x123   :  { %v601_v43 = vmax.f32 %v298_v41, 0.0  ;;  %v602_v44 = vmax.f32 %v318_v42, 0.0  ;;  %v2534_v41 = vld [vmem:[#allocation7 + $0x330] sm:$0xff] }
 0x124   :  { %v2542_v42 = vld [vmem:[#allocation7 + $0x370] sm:$0xff] }
 0x125   :  { %v617_v47 = vpack.c.bf16 %v601_v43, %v601_v43  ;;  %v618_v48 = vpack.c.bf16 %v602_v44, %v602_v44  ;;  %v2512_v43 = vld [vmem:[#allocation7 + $0x280] sm:$0xff] }
 0x126   :  { %v2520_v44 = vld [vmem:[#allocation7 + $0x2c0] sm:$0xff] }
 0x127   :  { %1669 = vmatmul.bf16.vlgmr.msra.gmra.mxu0 %v617_v47  ;;  %1682 = vmatmul.bf16.vlgmr.msra.gmra.mxu1 %v618_v48 }
 0x128   :  { %1765 = vmatpush.bf16.msra.mxu0 %v2503_v45  ;;  %1778 = vmatpush.bf16.msra.mxu1 %v2511_v46  ;;  %v2551_v45 = vld [vmem:[#allocation7 + $0x3b8] sm:$0xff] }
 0x129   :  { %v338_v51 = vpop.f32.mrf.mxu2  ;;  %v358_v52 = vpop.f32.mrf.mxu3  ;;  %v2559_v46 = vld [vmem:[#allocation7 + $0x3f8] sm:$0xff] }
 0x12a   :  { %v603_v53 = vmax.f32 %v338_v51, 0.0  ;;  %v604_v54 = vmax.f32 %v358_v52, 0.0  ;;  %v378_v61 = vpop.f32.mrf.mxu0  ;;  %v398_v62 = vpop.f32.mrf.mxu1  ;;  %v2550_v51 = vld [vmem:[#allocation7 + $0x3b0] sm:$0xff] }
 0x12b   :  { %v605_v3 = vmax.f32 %v378_v61, 0.0  ;;  %v606_v4 = vmax.f32 %v398_v62, 0.0  ;;  %v2558_v52 = vld [vmem:[#allocation7 + $0x3f0] sm:$0xff]  ;;  %v2548_v61 = vld [vmem:[#allocation7 + $0x3a0] sm:$0xff] }
 0x12c   :  { %v619_v57 = vpack.c.bf16 %v603_v53, %v603_v53  ;;  %v620_v58 = vpack.c.bf16 %v604_v54, %v604_v54  ;;  %1766 = vmatpush.bf16.msra.mxu0 %v2502_v49  ;;  %1779 = vmatpush.bf16.msra.mxu1 %v2510_v50  ;;  %v2533_v49 = vld [vmem:[#allocation7 + $0x328] sm:$0xff]  ;;  %v2556_v62 = vld [vmem:[#allocation7 + $0x3e0] sm:$0xff] }
 0x12d   :  { %v621_v11 = vpack.c.bf16 %v605_v3, %v605_v3  ;;  %v622_v12 = vpack.c.bf16 %v606_v4, %v606_v4  ;;  %v2541_v50 = vld [vmem:[#allocation7 + $0x368] sm:$0xff] }
 0x12e   :  { %1695 = vmatmul.bf16.vlgmr.msra.gmra.mxu2 %v619_v57  ;;  %1708 = vmatmul.bf16.vlgmr.msra.gmra.mxu3 %v620_v58  ;;  %v2549_v57 = vld [vmem:[#allocation7 + $0x3a8] sm:$0xff] }
 0x12f   :  { %1791 = vmatpush.bf16.msra.mxu2 %v2519_v55  ;;  %1804 = vmatpush.bf16.msra.mxu3 %v2527_v56  ;;  %v2532_v55 = vld [vmem:[#allocation7 + $0x320] sm:$0xff]  ;;  %v2557_v58 = vld [vmem:[#allocation7 + $0x3e8] sm:$0xff] }
 0x130   :  { %1767 = vmatpush.bf16.msra.mxu0 %v2501_v59  ;;  %1780 = vmatpush.bf16.msra.mxu1 %v2509_v60  ;;  %v2540_v56 = vld [vmem:[#allocation7 + $0x360] sm:$0xff]  ;;  %v2531_v59 = vld [vmem:[#allocation7 + $0x318] sm:$0xff]  ;;  %v2529_v3 = vld [vmem:[#allocation7 + $0x308] sm:$0xff] }
 0x131   :  { %v418_v7 = vpop.f32.mrf.mxu2  ;;  %v438_v8 = vpop.f32.mrf.mxu3  ;;  %v2539_v60 = vld [vmem:[#allocation7 + $0x358] sm:$0xff]  ;;  %v2537_v4 = vld [vmem:[#allocation7 + $0x348] sm:$0xff] }
 0x132   :  { %v607_v15 = vmax.f32 %v418_v7, 0.0  ;;  %v608_v16 = vmax.f32 %v438_v8, 0.0  ;;  %v458_v25 = vpop.f32.mrf.mxu0  ;;  %v478_v26 = vpop.f32.mrf.mxu1  ;;  %v2546_v7 = vld [vmem:[#allocation7 + $0x390] sm:$0xff] }
 0x133   :  { %1792 = vmatpush.bf16.msra.mxu2 %v2518_v63  ;;  %1805 = vmatpush.bf16.msra.mxu3 %v2526_v0  ;;  %v609_v31 = vmax.f32 %v458_v25, 0.0  ;;  %v610_v32 = vmax.f32 %v478_v26, 0.0  ;;  %v2530_v63 = vld [vmem:[#allocation7 + $0x310] sm:$0xff] }
 0x134   :  { %1768 = vmatpush.bf16.msra.mxu0 %v2500_v1  ;;  %1781 = vmatpush.bf16.msra.mxu1 %v2508_v2  ;;  %v623_v21 = vpack.c.bf16 %v607_v15, %v607_v15  ;;  %v624_v22 = vpack.c.bf16 %v608_v16, %v608_v16  ;;  %v2538_v0 = vld [vmem:[#allocation7 + $0x350] sm:$0xff]  ;;  %v2547_v1 = vld [vmem:[#allocation7 + $0x398] sm:$0xff] }
 0x135   :  { %v625_v37 = vpack.c.bf16 %v609_v31, %v609_v31  ;;  %v626_v38 = vpack.c.bf16 %v610_v32, %v610_v32  ;;  %v2555_v2 = vld [vmem:[#allocation7 + $0x3d8] sm:$0xff]  ;;  %v2554_v8 = vld [vmem:[#allocation7 + $0x3d0] sm:$0xff] }
 0x137   :  { %1793 = vmatpush.bf16.msra.mxu2 %v2517_v5  ;;  %1806 = vmatpush.bf16.msra.mxu3 %v2525_v6 }
 0x138   :  { %1721 = vmatmul.bf16.vlgmr.msrb.gmra.mxu0 %v621_v11  ;;  %1734 = vmatmul.bf16.vlgmr.msrb.gmra.mxu1 %v622_v12 }
 0x139   :  { %1769 = vmatpush.bf16.msra.mxu0 %v2499_v9  ;;  %1782 = vmatpush.bf16.msra.mxu1 %v2507_v10  ;;  %v498_v39 = vpop.f32.mrf.mxu2  ;;  %v518_v40 = vpop.f32.mrf.mxu3  ;;  %v2528_v9 = vld [vmem:[#allocation7 + $0x300] sm:$0xff] }
 0x13a   :  { %v611_v47 = vmax.f32 %v498_v39, 0.0  ;;  %v612_v48 = vmax.f32 %v518_v40, 0.0  ;;  %v538_v5 = vpop.f32.mrf.mxu0  ;;  %v558_v6 = vpop.f32.mrf.mxu1  ;;  %v2536_v10 = vld [vmem:[#allocation7 + $0x340] sm:$0xff] }
 0x13b   :  { %1794 = vmatpush.bf16.msra.mxu2 %v2516_v13  ;;  %1807 = vmatpush.bf16.msra.mxu3 %v2524_v14  ;;  %v613_v11 = vmax.f32 %v538_v5, 0.0  ;;  %v614_v12 = vmax.f32 %v558_v6, 0.0  ;;  %v2545_v13 = vld [vmem:[#allocation7 + $0x388] sm:$0xff] }
 0x13c   :  { %v627_v53 = vpack.c.bf16 %v611_v47, %v611_v47  ;;  %v628_v54 = vpack.c.bf16 %v612_v48, %v612_v48  ;;  %v2553_v14 = vld [vmem:[#allocation7 + $0x3c8] sm:$0xff] }
 0x13d   :  { %1770 = vmatpush.bf16.msra.mxu0 %v2498_v17  ;;  %1783 = vmatpush.bf16.msra.mxu1 %v2506_v18  ;;  %v629_v17 = vpack.c.bf16 %v613_v11, %v613_v11  ;;  %v630_v18 = vpack.c.bf16 %v614_v12, %v614_v12 }
 0x13e   :  { %1747 = vmatmul.bf16.vlgmr.msrb.gmra.mxu2 %v623_v21  ;;  %1760 = vmatmul.bf16.vlgmr.msrb.gmra.mxu3 %v624_v22 }
 0x13f   :  { %1795 = vmatpush.bf16.msra.mxu2 %v2515_v19  ;;  %1808 = vmatpush.bf16.msra.mxu3 %v2523_v20  ;;  %v2544_v19 = vld [vmem:[#allocation7 + $0x380] sm:$0xff] }
 0x140   :  { %v2552_v20 = vld [vmem:[#allocation7 + $0x3c0] sm:$0xff] }
 0x141   :  { %1771 = vmatpush.bf16.msra.mxu0 %v2497_v23  ;;  %1784 = vmatpush.bf16.msra.mxu1 %v2505_v24  ;;  %v578_v15 = vpop.f32.mrf.mxu2  ;;  %v598_v16 = vpop.f32.mrf.mxu3 }
 0x142   :  { %v615_v21 = vmax.f32 %v578_v15, 0.0  ;;  %v616_v22 = vmax.f32 %v598_v16, 0.0 }
 0x143   :  { %1796 = vmatpush.bf16.msra.mxu2 %v2514_v27  ;;  %1809 = vmatpush.bf16.msra.mxu3 %v2522_v28 }
 0x144   :  { %v631_v23 = vpack.c.bf16 %v615_v21, %v615_v21  ;;  %v632_v24 = vpack.c.bf16 %v616_v22, %v616_v22 }
 0x145   :  { %1772 = vmatpush.bf16.msra.mxu0 %v2496_v29  ;;  %1785 = vmatpush.bf16.msra.mxu1 %v2504_v30 }
 0x147   :  { %1797 = vmatpush.bf16.msra.mxu2 %v2513_v35  ;;  %1810 = vmatpush.bf16.msra.mxu3 %v2521_v36  ;;  %v2568_v35 = vld [vmem:[%s2770_s3] ss:$0 sm:$0xff]  ;;  %s2678_s3 = smov [#allocation8]  }
 0x148   :  { %1773 = vmatmul.bf16.vlgmr.msra.gmra.mxu0 %v625_v37  ;;  %1786 = vmatmul.bf16.vlgmr.msra.gmra.mxu1 %v626_v38  ;;  %s1875_s7 = sshll.u32 %s2678_s3, 4  ;;  %s1876_s7 = int_to_ptr.vmem [resolvable:$true] %s1875_s7 }
 0x149   :  { %1817 = vmatpush.bf16.msrb.mxu0 %v2535_v33  ;;  %1830 = vmatpush.bf16.msrb.mxu1 %v2543_v34 }
 0x14b   :  { %1798 = vmatpush.bf16.msra.mxu2 %v2512_v43  ;;  %1811 = vmatpush.bf16.msra.mxu3 %v2520_v44 }
 0x14d   :  { %1818 = vmatpush.bf16.msrb.mxu0 %v2534_v41  ;;  %1831 = vmatpush.bf16.msrb.mxu1 %v2542_v42 }
 0x14e   :  { %1799 = vmatmul.bf16.vlgmr.msra.gmra.mxu2 %v627_v53  ;;  %1812 = vmatmul.bf16.vlgmr.msra.gmra.mxu3 %v628_v54 }
 0x14f   :  { %1843 = vmatpush.bf16.msrb.mxu2 %v2551_v45  ;;  %1856 = vmatpush.bf16.msrb.mxu3 %v2559_v46 }
 0x151   :  { %1819 = vmatpush.bf16.msrb.mxu0 %v2533_v49  ;;  %1832 = vmatpush.bf16.msrb.mxu1 %v2541_v50 }
 0x153   :  { %1844 = vmatpush.bf16.msrb.mxu2 %v2550_v51  ;;  %1857 = vmatpush.bf16.msrb.mxu3 %v2558_v52 }
 0x155   :  { %1820 = vmatpush.bf16.msrb.mxu0 %v2532_v55  ;;  %1833 = vmatpush.bf16.msrb.mxu1 %v2540_v56 }
 0x157   :  { %1845 = vmatpush.bf16.msrb.mxu2 %v2549_v57  ;;  %1858 = vmatpush.bf16.msrb.mxu3 %v2557_v58 }
 0x159   :  { %1821 = vmatpush.bf16.msrb.mxu0 %v2531_v59  ;;  %1834 = vmatpush.bf16.msrb.mxu1 %v2539_v60 }
 0x15b   :  { %1846 = vmatpush.bf16.msrb.mxu2 %v2548_v61  ;;  %1859 = vmatpush.bf16.msrb.mxu3 %v2556_v62 }
 0x15d   :  { %1822 = vmatpush.bf16.msrb.mxu0 %v2530_v63  ;;  %1835 = vmatpush.bf16.msrb.mxu1 %v2538_v0 }
 0x15f   :  { %1847 = vmatpush.bf16.msrb.mxu2 %v2547_v1  ;;  %1860 = vmatpush.bf16.msrb.mxu3 %v2555_v2 }
 0x161   :  { %1823 = vmatpush.bf16.msrb.mxu0 %v2529_v3  ;;  %1836 = vmatpush.bf16.msrb.mxu1 %v2537_v4 }
 0x163   :  { %1848 = vmatpush.bf16.msrb.mxu2 %v2546_v7  ;;  %1861 = vmatpush.bf16.msrb.mxu3 %v2554_v8 }
 0x165   :  { %1824 = vmatpush.bf16.msrb.mxu0 %v2528_v9  ;;  %1837 = vmatpush.bf16.msrb.mxu1 %v2536_v10 }
 0x167   :  { %1849 = vmatpush.bf16.msrb.mxu2 %v2545_v13  ;;  %1862 = vmatpush.bf16.msrb.mxu3 %v2553_v14 }
 0x168   :  { %1825 = vmatmul.bf16.vlgmr.msrb.gmra.mxu0 %v629_v17  ;;  %1838 = vmatmul.bf16.vlgmr.msrb.gmra.mxu1 %v630_v18 }
 0x16b   :  { %1850 = vmatpush.bf16.msrb.mxu2 %v2544_v19  ;;  %1863 = vmatpush.bf16.msrb.mxu3 %v2552_v20 }
 0x16e   :  { %1851 = vmatmul.bf16.vlgmr.msrb.gmra.mxu2 %v631_v23  ;;  %1864 = vmatmul.bf16.vlgmr.msrb.gmra.mxu3 %v632_v24 }
 0x1a4   :  { %v1670_v25 = vpop.f32.mrf.mxu0  ;;  %v1683_v26 = vpop.f32.mrf.mxu1 }
 0x1a5   :  { %v1671_v38 = vadd.f32 %v2568_v35, %v1670_v25 }
 0x1a7   :  { %v1684_v41 = vadd.f32 %v1683_v26, %v1671_v38 }
 0x1ac   :  { %v1672_v27 = vpop.f32.mrf.mxu0  ;;  %v1685_v28 = vpop.f32.mrf.mxu1 }
 0x1b1   :  { %v1696_v29 = vpop.f32.mrf.mxu2  ;;  %v1709_v30 = vpop.f32.mrf.mxu3 }
 0x1b2   :  { %v1697_v44 = vadd.f32 %v1696_v29, %v1684_v41 }
 0x1b4   :  { %v1710_v47 = vadd.f32 %v1709_v30, %v1697_v44 }
 0x1b5   :  { %v1722_v31 = vpop.f32.mrf.mxu0  ;;  %v1735_v32 = vpop.f32.mrf.mxu1 }
 0x1b6   :  { %v1723_v50 = vadd.f32 %v1722_v31, %v1710_v47 }
 0x1b8   :  { %v1736_v53 = vadd.f32 %v1735_v32, %v1723_v50 }
 0x1b9   :  { %v1698_v33 = vpop.f32.mrf.mxu2  ;;  %v1711_v34 = vpop.f32.mrf.mxu3 }
 0x1bd   :  { %v1724_v36 = vpop.f32.mrf.mxu0  ;;  %v1737_v37 = vpop.f32.mrf.mxu1 }
 0x1c1   :  { %v1748_v39 = vpop.f32.mrf.mxu2  ;;  %v1761_v40 = vpop.f32.mrf.mxu3 }
 0x1c2   :  { %v1749_v54 = vadd.f32 %v1748_v39, %v1736_v53 }
 0x1c4   :  { %v1762_v55 = vadd.f32 %v1761_v40, %v1749_v54 }
 0x1c5   :  { %v1774_v42 = vpop.f32.mrf.mxu0  ;;  %v1787_v43 = vpop.f32.mrf.mxu1 }
 0x1c6   :  { %v1775_v58 = vadd.f32 %v1774_v42, %v1762_v55 }
 0x1c8   :  { %v1788_v59 = vadd.f32 %v1787_v43, %v1775_v58 }
 0x1c9   :  { %v1750_v45 = vpop.f32.mrf.mxu2  ;;  %v1763_v46 = vpop.f32.mrf.mxu3 }
 0x1cd   :  { %v1776_v48 = vpop.f32.mrf.mxu0  ;;  %v1789_v49 = vpop.f32.mrf.mxu1 }
 0x1d1   :  { %v1800_v51 = vpop.f32.mrf.mxu2  ;;  %v1813_v52 = vpop.f32.mrf.mxu3 }
 0x1d2   :  { %v1801_v62 = vadd.f32 %v1800_v51, %v1788_v59 }
 0x1d4   :  { %v1814_v63 = vadd.f32 %v1813_v52, %v1801_v62 }
 0x1d9   :  { %v1802_v56 = vpop.f32.mrf.mxu2  ;;  %v1815_v57 = vpop.f32.mrf.mxu3 }
 0x1e5   :  { %v1826_v60 = vpop.f32.mrf.mxu0  ;;  %v1839_v61 = vpop.f32.mrf.mxu1 }
 0x1e6   :  { %v1827_v0 = vadd.f32 %v1826_v60, %v1814_v63 }
 0x1e8   :  { %v1840_v3 = vadd.f32 %v1839_v61, %v1827_v0 }
 0x1ed   :  { %v1828_v1 = vpop.f32.mrf.mxu0  ;;  %v1841_v2 = vpop.f32.mrf.mxu1 }
 0x1f1   :  { %v1852_v4 = vpop.f32.mrf.mxu2  ;;  %v1865_v5 = vpop.f32.mrf.mxu3 }
 0x1f2   :  { %v1853_v6 = vadd.f32 %v1852_v4, %v1840_v3 }
 0x1f4   :  { %v1866_v7 = vadd.f32 %v1865_v5, %v1853_v6 }
 0x1f6   :  { %1869 = vst [vmem:[#allocation8] sm:$0xff] %v1866_v7 }
 0x1f7   :  { %1880 = dma.vmem_to_hbm [thread:$0]  %s1876_s7, 128, %s1878_s10, [#allocation4]  }
 0x1f9   :  { %v1854_v8 = vpop.f32.mrf.mxu2  ;;  %v1867_v9 = vpop.f32.mrf.mxu3 }
 0x1fa   :  { %2669 = dma.done.wait [#allocation4], 128  }
 0x1fb   :  { %2670 = vsyncadd [#allocation4], 4294967168 }
 0x1fc   :  { %1885 = vsyncpa [#allocation3], 1 }
 0x1fd   :  { %1886 = vsyncpa [#allocation6], 1 }
 0x1fe   :  { %1887 = vsyncpa [#allocation4], 1 }

</bundles_post_ra>
